<compile_context>
chip_gen: v6e
topology: v6e:2x2x1
jax: 0.10.0
libtpu: 0.0.40
codegen_flags: <defaults>
</compile_context>

<pallas_src>
import functools
import math

import jax
import jax.numpy as jnp
import numpy as np
from jax import lax
from jax.experimental import pallas as pl
from jax.experimental.pallas import tpu as pltpu

DIM = 1024  # Discriminator hidden width (hard-coded in the PyTorch module)

# Scoped-VMEM request: under v7x's 64 MiB physical, above v5e's 16 MiB default.
_VMEM_LIMIT_BYTES = 48 * 1024 * 1024
# Per-chunk row budget for the disc MLP ((rows, 1024) f32 hidden ~2 MiB) and the
# per-query-tile f32 score budget (~2 MiB).
_MLP_ROWS_TARGET = 512
_SCORES_BYTES_TARGET = 2 * 1024 * 1024


# ---------------------------------------------------------------------------
# Tuned-config plumbing.
#   * pl.Buffered(1) single-buffers grid-invariant (weight) operands — their
#     index_map is constant so double buffering only wastes VMEM (matters most
#     on v7x 64 MiB and v5e's 16 MiB scoped default).
#   * vmem_limit_bytes lets the bigger row tiles / resident weights fit.
# If the installed JAX/libtpu rejects either knob we fall back (once,
# permanently) to the vanilla configuration so the kernel still runs.
# ---------------------------------------------------------------------------
_TUNED = [True]


def _weight_spec(block_shape, index_map, tuned):
    if tuned:
        return pl.BlockSpec(block_shape, index_map, pipeline_mode=pl.Buffered(1))
    return pl.BlockSpec(block_shape, index_map)


def _compiler_params(semantics, tuned):
    if tuned:
        return pltpu.CompilerParams(dimension_semantics=semantics,
                                    vmem_limit_bytes=_VMEM_LIMIT_BYTES)
    return pltpu.CompilerParams(dimension_semantics=semantics)


def _pallas_call_compat(build_fn, *args):
    """build_fn(tuned) -> pallas_call callable; retries untuned on rejection."""
    if _TUNED[0]:
        try:
            return build_fn(True)(*args)
        except Exception:  # noqa: BLE001 — version-compat fallback only
            _TUNED[0] = False
    return build_fn(False)(*args)


def _pick_row_tile(m):
    """Largest row tile (multiple of 8, <=512) dividing m; else the full extent."""
    for t in (512, 256, 128, 64, 32, 16, 8):
        if m % t == 0:
            return t
    return m


def _largest_divisor(n, cap):
    cap = max(1, min(n, cap))
    for t in range(cap, 0, -1):
        if n % t == 0:
            return t
    return 1


# ---------------------------------------------------------------------------
# Kernel 1: row-tiled fused linear  y = x @ W + b
#   Used for the fused QKV projection (W = [Wq|Wk|Wv], shape (D, 3D)) and the
#   output projection.  bf16 MXU operands (pre-cast), f32 accumulation.  Rows
#   are tiled (cap 512) so the pipeline double-buffers and megacore can shard
#   the row axis; the weight/bias blocks have constant index_maps and are
#   requested single-buffered so only one VMEM copy is kept resident.
# ---------------------------------------------------------------------------
def _linear_kernel(x_ref, w_ref, b_ref, o_ref):
    y = jnp.dot(x_ref[...], w_ref[...], preferred_element_type=jnp.float32)
    o_ref[...] = (y + b_ref[...]).astype(o_ref.dtype)


def linear(x, w, b, *, out_dtype=jnp.float32):
    m, k = x.shape
    n = w.shape[1]
    tm = _pick_row_tile(m)
    b2d = b.reshape(1, n)

    def build(tuned):
        return pl.pallas_call(
            _linear_kernel,
            out_shape=jax.ShapeDtypeStruct((m, n), out_dtype),
            grid=(m // tm,),
            in_specs=[
                pl.BlockSpec((tm, k), lambda i: (i, 0)),
                _weight_spec((k, n), lambda i: (0, 0), tuned),   # resident weights
                _weight_spec((1, n), lambda i: (0, 0), tuned),
            ],
            out_specs=pl.BlockSpec((tm, n), lambda i: (i, 0)),
            compiler_params=_compiler_params(("parallel",), tuned),
        )

    return _pallas_call_compat(build, x, w, b2d)


# ---------------------------------------------------------------------------
# Kernel 2: fused Discriminator + BCE + rank-1 attention, one batch per step.
#   qkv_ref : (S, 3D) bf16 slab for batch b — [q | k | v] along lanes, heads
#             packed head-major inside each third (no wrapper head-split).
#   output  : (S, H*Dh) bf16 — context with heads merged (lane-dense stores).
#   Stage 1 tiles the MLP over `ts` sequence positions (2*H*ts rows per chunk),
#   Stage 2 tiles the attention over `tq` query positions, so the working set
#   stays a few MiB regardless of S / H.
# ---------------------------------------------------------------------------
def _disc_attn_kernel(qkv_ref, w1_ref, b1_ref, w2_ref, b2_ref, w3_ref, b3_ref,
                      o_ref, qloss_ref, kloss_ref, *, n_head, head_dim, d_model,
                      ts, tq, scale, target_is_one):
    H, Dh, D = n_head, head_dim, d_model
    S = o_ref.shape[0]

    w1 = w1_ref[...]        # (Dh, DIM)  bf16
    b1 = b1_ref[...]        # (1, DIM)   f32
    w2 = w2_ref[...]        # (DIM, DIM) bf16
    b2 = b2_ref[...]        # (1, DIM)   f32
    w3 = w3_ref[...]        # (1, DIM)   f32  (final layer runs on the VPU)
    b3 = b3_ref[...]        # (1, 1)     f32

    # ---- Stage 1: Discriminator MLP + BCE on all q- and k-rows, row-tiled ----
    def mlp_chunk(c, carry):
        s0 = pl.multiple_of(c * ts, ts)
        # Gather the per-(side, head) Dh-wide feature slices of this chunk and
        # stack them along sublanes: row order = (side, head, position).
        rows = [qkv_ref[pl.ds(s0, ts), pl.ds(side * D + h * Dh, Dh)]
                for side in range(2) for h in range(H)]
        x = jnp.concatenate(rows, axis=0)                       # (2*H*ts, Dh) bf16
        h1 = jnp.dot(x, w1, preferred_element_type=jnp.float32) + b1
        h1 = jnp.maximum(h1, 0.0).astype(jnp.bfloat16)
        h2 = jnp.dot(h1, w2, preferred_element_type=jnp.float32) + b2
        h2 = jnp.maximum(h2, 0.0)
        # Final 1024 -> 1 layer as VPU multiply + lane reduce (an N=1 matmul
        # would use <1% of the MXU columns).
        logit = jnp.sum(h2 * w3, axis=-1, keepdims=True) + b3   # (2*H*ts, 1)
        # BCELoss(sigmoid(logit), target) in softplus form (numerically stable),
        # with torch's -100 clamp on the log terms (loss clamped at 100):
        #   target=1: -log(sigmoid(z))     = softplus(-z)
        #   target=0: -log(1 - sigmoid(z)) = softplus(z)
        z = -logit if target_is_one else logit
        loss = jnp.minimum(jnp.maximum(z, 0.0)
                           + jnp.log(1.0 + jnp.exp(-jnp.abs(z))), 100.0)
        for h in range(H):
            qloss_ref[pl.ds(s0, ts), pl.ds(h, 1)] = loss[h * ts:(h + 1) * ts]
            kloss_ref[pl.ds(s0, ts), pl.ds(h, 1)] = loss[(H + h) * ts:(H + h + 1) * ts]
        return carry

    n_chunks = S // ts
    lax.fori_loop(0, n_chunks, mlp_chunk, 0, unroll=n_chunks <= 2)

    # ---- Stage 2: rank-1 attention scores / softmax / probs @ V, q-tiled -----
    kl_t = jnp.transpose(kloss_ref[...], (1, 0))                # (H, S), tiny
    # TODO(synk): for very long S also tile the key axis with an online-softmax
    # accumulator; only the query axis is tiled here.
    # TODO(synk): when B < num TensorCores (v7x), add a parallel q-tile/head grid
    # axis so both cores are busy.

    def q_tile(t, carry):
        q0 = pl.multiple_of(t * tq, tq)
        pieces = []
        for h in range(H):                                      # static head loop
            qcol = qloss_ref[pl.ds(q0, tq), pl.ds(h, 1)]        # (tq, 1) f32
            scores = (qcol * kl_t[h:h + 1, :]) * scale          # (tq, S) f32
            m = jnp.max(scores, axis=-1, keepdims=True)
            e = jnp.exp(scores - m)
            p = e * pl.reciprocal(jnp.sum(e, axis=-1, keepdims=True), approx=True)
            v_h = qkv_ref[pl.ds(0, S), pl.ds(2 * D + h * Dh, Dh)]   # (S, Dh) bf16
            pieces.append(jnp.dot(p.astype(jnp.bfloat16), v_h,
                                  preferred_element_type=jnp.float32))
        # Merge heads in registers; single lane-dense (tq, H*Dh) store.
        o_ref[pl.ds(q0, tq), :] = jnp.concatenate(pieces, axis=-1).astype(o_ref.dtype)
        return carry

    n_qt = S // tq
    lax.fori_loop(0, n_qt, q_tile, 0, unroll=n_qt <= 2)


def fused_disc_attention(qkv, w1, b1, w2, b2, w3_row, b3, *, n_head, head_dim,
                         scale, target_is_one):
    B, S, three_d = qkv.shape
    D = n_head * head_dim
    assert three_d == 3 * D

    # Static in-kernel tile sizes (divisors of S, sized for the VMEM budgets).
    ts = _largest_divisor(S, max(1, _MLP_ROWS_TARGET // (2 * n_head)))
    tq = _largest_divisor(S, max(8, _SCORES_BYTES_TARGET // (4 * S)))

    kernel = functools.partial(
        _disc_attn_kernel, n_head=n_head, head_dim=head_dim, d_model=D,
        ts=ts, tq=tq, scale=scale, target_is_one=target_is_one)

    def build(tuned):
        return pl.pallas_call(
            kernel,
            out_shape=jax.ShapeDtypeStruct((B, S, D), jnp.bfloat16),
            grid=(B,),
            in_specs=[
                pl.BlockSpec((None, S, 3 * D), lambda b: (b, 0, 0)),
                _weight_spec((head_dim, DIM), lambda b: (0, 0), tuned),  # disc weights
                _weight_spec((1, DIM), lambda b: (0, 0), tuned),         # stay VMEM-
                _weight_spec((DIM, DIM), lambda b: (0, 0), tuned),       # resident for
                _weight_spec((1, DIM), lambda b: (0, 0), tuned),         # the whole
                _weight_spec((1, DIM), lambda b: (0, 0), tuned),         # grid
                _weight_spec((1, 1), lambda b: (0, 0), tuned),
            ],
            out_specs=pl.BlockSpec((None, S, D), lambda b: (b, 0, 0)),
            scratch_shapes=[pltpu.VMEM((S, n_head), jnp.float32),   # q losses (S, H)
                            pltpu.VMEM((S, n_head), jnp.float32)],  # k losses (S, H)
            compiler_params=_compiler_params(("parallel",), tuned),
        )

    return _pallas_call_compat(build, qkv, w1, b1, w2, b2, w3_row, b3)


# ---------------------------------------------------------------------------
# One-time parameter preprocessing (hoisted out of the per-call path).
# ---------------------------------------------------------------------------
def prepare_params(params):
    bf16 = jnp.bfloat16
    f32 = jnp.float32
    d_model = params['wq'].shape[0]
    return {
        'w_qkv': jnp.concatenate([params['wq'], params['wk'], params['wv']],
                                 axis=1).astype(bf16),                    # (D, 3D)
        'b_qkv': jnp.concatenate([params['bq'], params['bk'],
                                  params['bv']]).astype(f32),             # (3D,)
        'wo': params['wo'].astype(bf16),
        'bo': params['bo'].astype(f32),
        'dw1': params['dw1'].astype(bf16),
        'db1': params['db1'].reshape(1, DIM).astype(f32),
        'dw2': params['dw2'].astype(bf16),
        'db2': params['db2'].reshape(1, DIM).astype(f32),
        'dw3_row': params['dw3'].reshape(1, DIM).astype(f32),
        'db3': params['db3'].reshape(1, 1).astype(f32),
        'd_model': d_model,
    }


# ---------------------------------------------------------------------------
# Full forward (remaining glue: the same two layout transposes torch performs)
# ---------------------------------------------------------------------------
def attention_forward(prepared, hidden_states, *, n_head, is_source=False,
                      out_dtype=jnp.float32):
    S, B, D = hidden_states.shape
    Dh = D // n_head

    # hidden_states.transpose(0, 1) -> (B, S, D); rows for the projections.
    x = jnp.transpose(hidden_states, (1, 0, 2)).reshape(B * S, D).astype(jnp.bfloat16)

    # Fused Q/K/V projection: one kernel, x read once, W = [Wq | Wk | Wv].
    qkv = linear(x, prepared['w_qkv'], prepared['b_qkv'], out_dtype=jnp.bfloat16)
    qkv = qkv.reshape(B, S, 3 * D)   # free reshape; q|k|v stay packed along lanes

    # pre(.) modeled as identity (user-supplied callable in the PyTorch ctor).
    # TODO(synk): plug a real `pre` transform here if one is supplied.
    target_is_one = not is_source    # is_source -> zeros target, else ones target

    ctx = fused_disc_attention(
        qkv,
        prepared['dw1'], prepared['db1'],
        prepared['dw2'], prepared['db2'],
        prepared['dw3_row'], prepared['db3'],
        n_head=n_head, head_dim=Dh, scale=1.0 / math.sqrt(Dh),
        target_is_one=target_is_one)                                   # (B, S, D) bf16

    # Output projection on (B*S, D) rows, then lay out as (S, B, D) like the
    # PyTorch permute(2, 0, 1, 3).view(S, B, D) -> Linear path.
    out = linear(ctx.reshape(B * S, D), prepared['wo'], prepared['bo'],
                 out_dtype=out_dtype)
    out = jnp.transpose(out.reshape(B, S, D), (1, 0, 2))               # (S, B, D)
    loss = 0.0
    return out, loss


# ---------------------------------------------------------------------------
# Pure-JAX f32 reference (torch-faithful math, no Pallas) for a sanity check
# ---------------------------------------------------------------------------
def attention_reference(params, hidden_states, *, n_head, is_source=False):
    S, B, D = hidden_states.shape
    H = n_head
    Dh = D // H
    x = jnp.transpose(hidden_states, (1, 0, 2))

    def lin(t, w, b):
        return t @ w + b

    q = lin(x, params['wq'], params['bq'])
    k = lin(x, params['wk'], params['bk'])
    v = lin(x, params['wv'], params['bv'])

    def to_heads(t):
        return jnp.transpose(t.reshape(B, S, H, Dh), (0, 2, 1, 3))

    qh, kh, vh = to_heads(q), to_heads(k), to_heads(v)

    def disc_bce(t):
        h = jnp.maximum(t @ params['dw1'] + params['db1'], 0.0)
        h = jnp.maximum(h @ params['dw2'] + params['db2'], 0.0)
        p = jax.nn.sigmoid(h @ params['dw3'] + params['db3'])
        if is_source:
            return -jnp.maximum(jnp.log(1.0 - p), -100.0)
        return -jnp.maximum(jnp.log(p), -100.0)

    qs, ks = disc_bce(qh), disc_bce(kh)                     # (B, H, S, 1)
    scores = (qs @ jnp.swapaxes(ks, -1, -2)) / math.sqrt(Dh)
    probs = jax.nn.softmax(scores, axis=-1)
    ctx = probs @ vh                                        # (B, H, S, Dh)
    ctx = jnp.transpose(ctx, (2, 0, 1, 3)).reshape(S, B, D)
    return lin(ctx, params['wo'], params['bo']), 0.0


# ---------------------------------------------------------------------------
# Deterministic parameter init (shapes from the module __init__)
# ---------------------------------------------------------------------------
def make_params(key, d_model, n_head):
    dh = d_model // n_head
    ks = jax.random.split(key, 7)

    def xavier(k, fan_in, fan_out):
        std = math.sqrt(2.0 / (fan_in + fan_out))
        return (std * jax.random.normal(k, (fan_in, fan_out))).astype(jnp.float32)

    z = lambda n: jnp.zeros((n,), jnp.float32)
    return {
        'wq': xavier(ks[0], d_model, d_model), 'bq': z(d_model),
        'wk': xavier(ks[1], d_model, d_model), 'bk': z(d_model),
        'wv': xavier(ks[2], d_model, d_model), 'bv': z(d_model),
        'wo': xavier(ks[3], d_model, d_model), 'bo': z(d_model),
        'dw1': xavier(ks[4], dh, DIM), 'db1': z(DIM),
        'dw2': xavier(ks[5], DIM, DIM), 'db2': z(DIM),
        'dw3': xavier(ks[6], DIM, 1), 'db3': z(1),
    }


if __name__ == "__main__":
    S, B, d_model, n_head = 8, 2, 32, 4  # small shapes; Dh = 8

    key = jax.random.PRNGKey(0)
    kp, kx = jax.random.split(key)
    params = make_params(kp, d_model, n_head)
    prepared = prepare_params(params)   # one-time weight concat / bf16 casts
    hidden_states = jax.random.normal(kx, (S, B, d_model), jnp.float32)

    # Check both BCE-target branches against the f32 reference.  The kernel runs
    # bf16 MXU operands with f32 accumulation (plus an approximate softmax
    # reciprocal), so tolerances are set at bf16 level rather than bit parity.
    for is_source in (False, True):
        out, loss = attention_forward(prepared, hidden_states, n_head=n_head,
                                      is_source=is_source)
        out = jax.block_until_ready(out)
        ref, _ = attention_reference(params, hidden_states, n_head=n_head,
                                     is_source=is_source)
        ref = jax.block_until_ready(ref)
        assert out.shape == (S, B, d_model)
        assert loss == 0.0
        np.testing.assert_allclose(np.asarray(out, np.float32), np.asarray(ref),
                                   rtol=3e-2, atol=3e-2)

    print("KERNEL_OK")
</pallas_src>

<mosaic_0001>
module attributes {stable_mosaic.version = 11 : i64} {
  func.func @_linear_kernel(%arg0: i32, %arg1: memref<16x32xbf16, #tpu.memory_space<vmem>>, %arg2: memref<32x96xbf16, #tpu.memory_space<vmem>>, %arg3: memref<1x96xf32, #tpu.memory_space<vmem>>, %arg4: memref<16x96xbf16, #tpu.memory_space<vmem>>) attributes {dimension_semantics = [#tpu.dimension_semantics<parallel>], iteration_bounds = array<i64: 1>, scalar_prefetch = 0 : i64, scratch_operands = 0 : i64, tpu.core_type = #tpu.core_type<tc>, window_params = [{transform_indices = @transform_0, window_bounds = array<i64: 16, 32>}, {pipeline_mode = #tpu.pipeline_mode<synchronous>, transform_indices = @transform_1, window_bounds = array<i64: 32, 96>}, {pipeline_mode = #tpu.pipeline_mode<synchronous>, transform_indices = @transform_2, window_bounds = array<i64: 1, 96>}, {transform_indices = @transform_3, window_bounds = array<i64: 16, 96>}]} {
    %c0 = arith.constant 0 : index
    %c0_0 = arith.constant 0 : index
    %0 = vector.load %arg1[%c0, %c0_0] : memref<16x32xbf16, #tpu.memory_space<vmem>>, vector<16x32xbf16>
    %c0_1 = arith.constant 0 : index
    %c0_2 = arith.constant 0 : index
    %1 = vector.load %arg2[%c0_1, %c0_2] : memref<32x96xbf16, #tpu.memory_space<vmem>>, vector<32x96xbf16>
    %cst = arith.constant dense<0.000000e+00> : vector<16x96xf32>
    %2 = tpu.matmul %0, %1, %cst {dimension_numbers = #tpu.dot_dimension_numbers<[1], [0], [0], [1], [0, 0, 1, 1], [], []>} : vector<16x32xbf16>, vector<32x96xbf16>, vector<16x96xf32> -> vector<16x96xf32>
    %c0_3 = arith.constant 0 : index
    %c0_4 = arith.constant 0 : index
    %3 = vector.load %arg3[%c0_3, %c0_4] : memref<1x96xf32, #tpu.memory_space<vmem>>, vector<1x96xf32>
    %4 = vector.broadcast %3 : vector<1x96xf32> to vector<16x96xf32>
    %5 = arith.addf %2, %4 : vector<16x96xf32>
    %6 = arith.truncf %5 : vector<16x96xf32> to vector<16x96xbf16>
    %c0_5 = arith.constant 0 : index
    %c0_6 = arith.constant 0 : index
    %7 = vector.load %arg4[%c0_5, %c0_6] : memref<16x96xbf16, #tpu.memory_space<vmem>>, vector<16x96xbf16>
    tpu.vector_store %arg4[%c0_5, %c0_6], %6 {strides = array<i32>} : memref<16x96xbf16, #tpu.memory_space<vmem>>, vector<16x96xbf16>,
    return
  }
  func.func @transform_0(%arg0: i32) -> (i32, i32) {
    %c0_i32 = arith.constant 0 : i32
    %c0_i32_0 = arith.constant 0 : i32
    return %arg0, %c0_i32 : i32, i32
  }
  func.func @transform_1(%arg0: i32) -> (i32, i32) {
    %c0_i32 = arith.constant 0 : i32
    %c0_i32_0 = arith.constant 0 : i32
    %c0_i32_1 = arith.constant 0 : i32
    return %c0_i32, %c0_i32_0 : i32, i32
  }
  func.func @transform_2(%arg0: i32) -> (i32, i32) {
    %c0_i32 = arith.constant 0 : i32
    %c0_i32_0 = arith.constant 0 : i32
    %c0_i32_1 = arith.constant 0 : i32
    return %c0_i32, %c0_i32_0 : i32, i32
  }
  func.func @transform_3(%arg0: i32) -> (i32, i32) {
    %c0_i32 = arith.constant 0 : i32
    %c0_i32_0 = arith.constant 0 : i32
    return %arg0, %c0_i32 : i32, i32
  }
}

module attributes {stable_mosaic.version = 11 : i64} {
  func.func @_linear_kernel(%arg0: i32, %arg1: memref<16x32xbf16, #tpu.memory_space<vmem>>, %arg2: memref<32x96xbf16, #tpu.memory_space<vmem>>, %arg3: memref<1x96xf32, #tpu.memory_space<vmem>>, %arg4: memref<16x96xbf16, #tpu.memory_space<vmem>>) attributes {dimension_semantics = [#tpu.dimension_semantics<parallel>], iteration_bounds = array<i64: 1>, scalar_prefetch = 0 : i64, scratch_operands = 0 : i64, tpu.core_type = #tpu.core_type<tc>, window_params = [{transform_indices = @transform_0, window_bounds = array<i64: 16, 32>}, {pipeline_mode = #tpu.pipeline_mode<synchronous>, transform_indices = @transform_1, window_bounds = array<i64: 32, 96>}, {pipeline_mode = #tpu.pipeline_mode<synchronous>, transform_indices = @transform_2, window_bounds = array<i64: 1, 96>}, {transform_indices = @transform_3, window_bounds = array<i64: 16, 96>}]} {
    %c0 = arith.constant 0 : index
    %c0_0 = arith.constant 0 : index
    %0 = vector.load %arg1[%c0, %c0_0] : memref<16x32xbf16, #tpu.memory_space<vmem>>, vector<16x32xbf16>
    %c0_1 = arith.constant 0 : index
    %c0_2 = arith.constant 0 : index
    %1 = vector.load %arg2[%c0_1, %c0_2] : memref<32x96xbf16, #tpu.memory_space<vmem>>, vector<32x96xbf16>
    %cst = arith.constant dense<0.000000e+00> : vector<16x96xf32>
    %2 = tpu.matmul %0, %1, %cst {dimension_numbers = #tpu.dot_dimension_numbers<[1], [0], [0], [1], [0, 0, 1, 1], [], []>} : vector<16x32xbf16>, vector<32x96xbf16>, vector<16x96xf32> -> vector<16x96xf32>
    %c0_3 = arith.constant 0 : index
    %c0_4 = arith.constant 0 : index
    %3 = vector.load %arg3[%c0_3, %c0_4] : memref<1x96xf32, #tpu.memory_space<vmem>>, vector<1x96xf32>
    %4 = vector.broadcast %3 : vector<1x96xf32> to vector<16x96xf32>
    %5 = arith.addf %2, %4 : vector<16x96xf32>
    %6 = arith.truncf %5 : vector<16x96xf32> to vector<16x96xbf16>
    %c0_5 = arith.constant 0 : index
    %c0_6 = arith.constant 0 : index
    %7 = vector.load %arg4[%c0_5, %c0_6] : memref<16x96xbf16, #tpu.memory_space<vmem>>, vector<16x96xbf16>
    tpu.vector_store %arg4[%c0_5, %c0_6], %6 {strides = array<i32>} : memref<16x96xbf16, #tpu.memory_space<vmem>>, vector<16x96xbf16>,
    return
  }
  func.func @transform_0(%arg0: i32) -> (i32, i32) {
    %c0_i32 = arith.constant 0 : i32
    %c0_i32_0 = arith.constant 0 : i32
    return %arg0, %c0_i32 : i32, i32
  }
  func.func @transform_1(%arg0: i32) -> (i32, i32) {
    %c0_i32 = arith.constant 0 : i32
    %c0_i32_0 = arith.constant 0 : i32
    %c0_i32_1 = arith.constant 0 : i32
    return %c0_i32, %c0_i32_0 : i32, i32
  }
  func.func @transform_2(%arg0: i32) -> (i32, i32) {
    %c0_i32 = arith.constant 0 : i32
    %c0_i32_0 = arith.constant 0 : i32
    %c0_i32_1 = arith.constant 0 : i32
    return %c0_i32, %c0_i32_0 : i32, i32
  }
  func.func @transform_3(%arg0: i32) -> (i32, i32) {
    %c0_i32 = arith.constant 0 : i32
    %c0_i32_0 = arith.constant 0 : i32
    return %arg0, %c0_i32 : i32, i32
  }
}

</mosaic_0001>

<bundles_post_ra>
// kernel: tpu_custom_call.1
= control target key start
LH: loop header
LB: loop body
LE: loop exit
PB: predicated region body
PF: predicated region fallthrough
CT: control target
= control target key end

     0   :  { %8 = vsyncpa [#allocation3], 0  ;;  %s292_s0 = inlined_call_operand.hbm [shape: bf16[16,32], index: 0, kind: input, shape index: {}]   ;;  %s293_s1 = inlined_call_operand.hbm [shape: bf16[32,96], index: 1, kind: input, shape index: {}]   ;;  %s294_s2 = inlined_call_operand.vmem [shape: f32[1,96], index: 2, kind: input, shape index: {}]   ;;  %s295_s3 = inlined_call_operand.hbm [shape: bf16[16,96], index: 3, kind: output, shape index: {}]  }
   0x1   :  { %9 = vsyncpa [#allocation6], 0 }
   0x2   :  { %10 = vsyncpa [#allocation4], 0  ;;  %s244_s12 = smov [#allocation2]  }
   0x3   :  { %s16_s13 = sshll.u32 %s244_s12, 4  ;;  %s17_s13 = int_to_ptr.vmem [resolvable:$true] %s16_s13 }
   0x4   :  { %s186_s14 = scalar_lea.vmem %s17_s13, 128  ;;  %p191_p1 = scmp.lt.s32.totalorder %s17_s13, %s17_s13 }
   0x5   :  { %p187_p0 = scmp.ne.s32.totalorder %s17_s13, %s186_s14  ;;  %p192_p2 = scmp.lt.s32.totalorder %s186_s14, %s186_s14 }
   0x7   :  { %p193_p3 = por %p192_p2, %p191_p1 }
   0x9   :  { %p194_p4 = pnand %p193_p3, %p187_p0 }
   0xb   :  { %197 = shalt.err (!%p194_p4)
}
   0xc   :  { %s245_s15 = smov 64   ;;  %s246_s16 = smov 4  }
   0xd   :  { %22 = dma.hbm_to_vmem [thread:$0]  %s292_s0, 128, %s17_s13, [#allocation3], %s245_s15, %s245_s15, %s246_s16  }
   0xe   :  { %s247_s19 = smov [#allocation5]  }
   0xf   :  { %s28_s20 = sshll.u32 %s247_s19, 4  ;;  %s29_s20 = int_to_ptr.vmem [resolvable:$true] %s28_s20 }
  0x10   :  { %s206_s21 = scalar_lea.vmem %s29_s20, 256  ;;  %p211_p6 = scmp.lt.s32.totalorder %s29_s20, %s29_s20 }
  0x11   :  { %p207_p5 = scmp.ne.s32.totalorder %s29_s20, %s206_s21  ;;  %p212_p7 = scmp.lt.s32.totalorder %s206_s21, %s206_s21 }
  0x13   :  { %p213_p8 = por %p212_p7, %p211_p6 }
  0x15   :  { %p214_p9 = pnand %p213_p8, %p207_p5 }
  0x17   :  { %217 = shalt.err (!%p214_p9)
}
  0x18   :  { %34 = dma.hbm_to_vmem [thread:$0]  %s293_s1, 256, %s29_s20, [#allocation6], %s245_s15, %s245_s15, %s246_s16  }
  0x19   :  { %238 = dma.done.wait [#allocation3], 128  }
  0x1a   :  { %239 = vsyncadd [#allocation3], 4294967168 }
  0x1b   :  { %240 = dma.done.wait [#allocation6], 256  }
  0x1c   :  { %241 = vsyncadd [#allocation6], 4294967040  ;;  %v248_v0 = vmov 0.0   ;;  %vm249_vm0 = vmmov 0   ;;  %v175_v1 = vld [vmem:[#allocation5 + $0x8] sm:$0xff]   ;;  %v176_v2 = vld [vmem:[#allocation5] sm:$0xff]  }
  0x1d   :  { %160 = vmatprep.subr.bf16.mxu0 %v248_v0  ;;  %164 = vmatprep.mubr.msk.bf16.mxu0 %vm249_vm0, %v248_v0  ;;  %v177_v3 = vld [vmem:[#allocation2] sm:$0xff]   ;;  %vm74_vm1 = vcmask 261120   ;;  %vm127_vm2 = vcmask 781312   ;;  %s250_s1 = smov [#allocation7]  }
  0x1e   :  { %161 = vmatpush3.bf16.msra.mxu0 %v175_v1  ;;  %v148_v4 = vld [vmem:[%s294_s2] ss:$0 sm:$0xff]  ;;  %s135_s25 = sshll.u32 %s250_s1, 4  ;;  %s136_s25 = int_to_ptr.vmem [resolvable:$true] %s135_s25 }
  0x1f   :  { %162 = vmatprep.subr.bf16.mxu0 %v248_v0  ;;  %s218_s26 = scalar_lea.vmem %s136_s25, 128  ;;  %p223_p11 = scmp.lt.s32.totalorder %s136_s25, %s136_s25 }
  0x20   :  { %p219_p10 = scmp.ne.s32.totalorder %s136_s25, %s218_s26  ;;  %p224_p12 = scmp.lt.s32.totalorder %s218_s26, %s218_s26 }
  0x22   :  { %163 = vmatpush3.bf16.msra.mxu0 %v176_v2  ;;  %p225_p13 = por %p224_p12, %p223_p11 }
  0x24   :  { %p226_p0 = pnand %p225_p13, %p219_p10 }
  0x25   :  { %165 = vmatmul.mubr.msk.bf16.vlgmr.msra.gmra.mxu0 %vm74_vm1, %v177_v3 }
  0xe5   :  { %v112_v5 = vpop.f32.mrf.mxu0 }
  0xe6   :  { %v113_v6 = vadd.f32 %v148_v4, %v112_v5 }
  0xe7   :  { %v166_v7 = vpop.f32.mrf.mxu0 }
  0xe8   :  { %v155_v8 = vpack.c.bf16 %v113_v6, %v113_v6 }
  0xe9   :  { %v115_v9 = vpop.f32.mrf.mxu0 }
  0xea   :  { %v116_v10 = vadd.f32 %v148_v4, %v115_v9  ;;  %128 = vst.msk [vmem:[#allocation7] sm:$0xf] %vm127_vm2, %v155_v8 }
  0xeb   :  { %v167_v11 = vpop.f32.mrf.mxu0 }
  0xec   :  { %v156_v12 = vpack.c.bf16 %v116_v10, %v116_v10 }
  0xee   :  { %129 = vst.msk [vmem:[#allocation7 + $0x4] sm:$0xf] %vm127_vm2, %v156_v12 }
  0xef   :  { %229 = shalt.err (!%p226_p0)
}
  0xf0   :  { %141 = dma.vmem_to_hbm [thread:$0]  %s136_s25, 128, %s295_s3, [#allocation4], %s245_s15, %s245_s15, %s246_s16  }
  0xf1   :  { %242 = dma.done.wait [#allocation4], 128  }
  0xf2   :  { %243 = vsyncadd [#allocation4], 4294967168 }
  0xf3   :  { %145 = vsyncpa [#allocation3], 1 }
  0xf4   :  { %146 = vsyncpa [#allocation6], 1 }
  0xf5   :  { %147 = vsyncpa [#allocation4], 1 }

// kernel: tpu_custom_call.1
= control target key start
LH: loop header
LB: loop body
LE: loop exit
PB: predicated region body
PF: predicated region fallthrough
CT: control target
= control target key end

     0   :  { %8 = vsyncpa [#allocation3], 0  ;;  %s292_s0 = inlined_call_operand.hbm [shape: bf16[16,32], index: 0, kind: input, shape index: {}]   ;;  %s293_s1 = inlined_call_operand.hbm [shape: bf16[32,96], index: 1, kind: input, shape index: {}]   ;;  %s294_s2 = inlined_call_operand.vmem [shape: f32[1,96], index: 2, kind: input, shape index: {}]   ;;  %s295_s3 = inlined_call_operand.hbm [shape: bf16[16,96], index: 3, kind: output, shape index: {}]  }
   0x1   :  { %9 = vsyncpa [#allocation6], 0 }
   0x2   :  { %10 = vsyncpa [#allocation4], 0  ;;  %s244_s12 = smov [#allocation2]  }
   0x3   :  { %s16_s13 = sshll.u32 %s244_s12, 4  ;;  %s17_s13 = int_to_ptr.vmem [resolvable:$true] %s16_s13 }
   0x4   :  { %s186_s14 = scalar_lea.vmem %s17_s13, 128  ;;  %p191_p1 = scmp.lt.s32.totalorder %s17_s13, %s17_s13 }
   0x5   :  { %p187_p0 = scmp.ne.s32.totalorder %s17_s13, %s186_s14  ;;  %p192_p2 = scmp.lt.s32.totalorder %s186_s14, %s186_s14 }
   0x7   :  { %p193_p3 = por %p192_p2, %p191_p1 }
   0x9   :  { %p194_p4 = pnand %p193_p3, %p187_p0 }
   0xb   :  { %197 = shalt.err (!%p194_p4)
}
   0xc   :  { %s245_s15 = smov 64   ;;  %s246_s16 = smov 4  }
   0xd   :  { %22 = dma.hbm_to_vmem [thread:$0]  %s292_s0, 128, %s17_s13, [#allocation3], %s245_s15, %s245_s15, %s246_s16  }
   0xe   :  { %s247_s19 = smov [#allocation5]  }
   0xf   :  { %s28_s20 = sshll.u32 %s247_s19, 4  ;;  %s29_s20 = int_to_ptr.vmem [resolvable:$true] %s28_s20 }
  0x10   :  { %s206_s21 = scalar_lea.vmem %s29_s20, 256  ;;  %p211_p6 = scmp.lt.s32.totalorder %s29_s20, %s29_s20 }
  0x11   :  { %p207_p5 = scmp.ne.s32.totalorder %s29_s20, %s206_s21  ;;  %p212_p7 = scmp.lt.s32.totalorder %s206_s21, %s206_s21 }
  0x13   :  { %p213_p8 = por %p212_p7, %p211_p6 }
  0x15   :  { %p214_p9 = pnand %p213_p8, %p207_p5 }
  0x17   :  { %217 = shalt.err (!%p214_p9)
}
  0x18   :  { %34 = dma.hbm_to_vmem [thread:$0]  %s293_s1, 256, %s29_s20, [#allocation6], %s245_s15, %s245_s15, %s246_s16  }
  0x19   :  { %238 = dma.done.wait [#allocation3], 128  }
  0x1a   :  { %239 = vsyncadd [#allocation3], 4294967168 }
  0x1b   :  { %240 = dma.done.wait [#allocation6], 256  }
  0x1c   :  { %241 = vsyncadd [#allocation6], 4294967040  ;;  %v248_v0 = vmov 0.0   ;;  %vm249_vm0 = vmmov 0   ;;  %v175_v1 = vld [vmem:[#allocation5 + $0x8] sm:$0xff]   ;;  %v176_v2 = vld [vmem:[#allocation5] sm:$0xff]  }
  0x1d   :  { %160 = vmatprep.subr.bf16.mxu0 %v248_v0  ;;  %164 = vmatprep.mubr.msk.bf16.mxu0 %vm249_vm0, %v248_v0  ;;  %v177_v3 = vld [vmem:[#allocation2] sm:$0xff]   ;;  %vm74_vm1 = vcmask 261120   ;;  %vm127_vm2 = vcmask 781312   ;;  %s250_s1 = smov [#allocation7]  }
  0x1e   :  { %161 = vmatpush3.bf16.msra.mxu0 %v175_v1  ;;  %v148_v4 = vld [vmem:[%s294_s2] ss:$0 sm:$0xff]  ;;  %s135_s25 = sshll.u32 %s250_s1, 4  ;;  %s136_s25 = int_to_ptr.vmem [resolvable:$true] %s135_s25 }
  0x1f   :  { %162 = vmatprep.subr.bf16.mxu0 %v248_v0  ;;  %s218_s26 = scalar_lea.vmem %s136_s25, 128  ;;  %p223_p11 = scmp.lt.s32.totalorder %s136_s25, %s136_s25 }
  0x20   :  { %p219_p10 = scmp.ne.s32.totalorder %s136_s25, %s218_s26  ;;  %p224_p12 = scmp.lt.s32.totalorder %s218_s26, %s218_s26 }
  0x22   :  { %163 = vmatpush3.bf16.msra.mxu0 %v176_v2  ;;  %p225_p13 = por %p224_p12, %p223_p11 }
  0x24   :  { %p226_p0 = pnand %p225_p13, %p219_p10 }
  0x25   :  { %165 = vmatmul.mubr.msk.bf16.vlgmr.msra.gmra.mxu0 %vm74_vm1, %v177_v3 }
  0xe5   :  { %v112_v5 = vpop.f32.mrf.mxu0 }
  0xe6   :  { %v113_v6 = vadd.f32 %v148_v4, %v112_v5 }
  0xe7   :  { %v166_v7 = vpop.f32.mrf.mxu0 }
  0xe8   :  { %v155_v8 = vpack.c.bf16 %v113_v6, %v113_v6 }
  0xe9   :  { %v115_v9 = vpop.f32.mrf.mxu0 }
  0xea   :  { %v116_v10 = vadd.f32 %v148_v4, %v115_v9  ;;  %128 = vst.msk [vmem:[#allocation7] sm:$0xf] %vm127_vm2, %v155_v8 }
  0xeb   :  { %v167_v11 = vpop.f32.mrf.mxu0 }
  0xec   :  { %v156_v12 = vpack.c.bf16 %v116_v10, %v116_v10 }
  0xee   :  { %129 = vst.msk [vmem:[#allocation7 + $0x4] sm:$0xf] %vm127_vm2, %v156_v12 }
  0xef   :  { %229 = shalt.err (!%p226_p0)
}
  0xf0   :  { %141 = dma.vmem_to_hbm [thread:$0]  %s136_s25, 128, %s295_s3, [#allocation4], %s245_s15, %s245_s15, %s246_s16  }
  0xf1   :  { %242 = dma.done.wait [#allocation4], 128  }
  0xf2   :  { %243 = vsyncadd [#allocation4], 4294967168 }
  0xf3   :  { %145 = vsyncpa [#allocation3], 1 }
  0xf4   :  { %146 = vsyncpa [#allocation6], 1 }
  0xf5   :  { %147 = vsyncpa [#allocation4], 1 }

</bundles_post_ra>
